<compile_context>
chip_gen: v5e
topology: v5e:2x2
jax: 0.10.0
libtpu: 0.0.40
codegen_flags: <defaults>
</compile_context>

<pallas_src>
import math

import jax
import jax.numpy as jnp
from jax.experimental import pallas as pl
from jax.experimental.pallas import tpu as pltpu

_LANE = 128      # TPU vreg lane width
_SUBLANE = 8     # TPU vreg sublane height (f32)


def _round_up(x, m):
    return ((x + m - 1) // m) * m


def _linear_relu_kernel(x_ref, w_ref, b_ref, o_ref):
    # x_ref: [TB, S], w_ref: [S, Lpad], b_ref: [1, Lpad], o_ref: [TB, Lpad]
    acc = jnp.dot(x_ref[...], w_ref[...], preferred_element_type=jnp.float32)
    acc = acc + b_ref[...].astype(jnp.float32)   # broadcast bias over batch
    o_ref[...] = jnp.maximum(acc, 0.0).astype(o_ref.dtype)


def prepare_params(w_head, b_head, dtype=None):
    """One-time parameter prep (call at init, NOT per forward):
      - transpose the PyTorch [L, S] weight to matmul-friendly [S, L]
      - zero-pad the output dim L up to a multiple of 128 so the kernel's
        weight / bias / output lane dim is dense (unmasked vst)
      - optionally cast storage to `dtype` (e.g. jnp.bfloat16) to halve the
        HBM bytes of this mem-bound op; accumulation stays f32 in-kernel.
    Returns (w_sl [S, Lpad], b2d [1, Lpad], L)."""
    L, S = w_head.shape
    if dtype is not None:
        w_head = w_head.astype(dtype)
        b_head = b_head.astype(dtype)
    Lpad = _round_up(L, _LANE)
    w_sl = jnp.zeros((S, Lpad), w_head.dtype).at[:, :L].set(w_head.T)
    b2d = jnp.zeros((1, Lpad), b_head.dtype).at[:, :L].set(b_head)
    return w_sl, b2d, L


def _pick_batch_tile(B, block_b):
    """Pick a sublane-aligned batch tile. For B large enough, ensure >= 2 grid
    steps so the 'parallel' axis can shard across both v7x TensorCores."""
    if B <= 2 * _SUBLANE:
        return B                       # full-extent block: always legal
    half = _round_up((B + 1) // 2, _SUBLANE)
    return max(_SUBLANE, min(block_b, half))


def forward(x, w_sl, b2d, out_features=None, *, block_b=1024):
    """relu(x @ W + b) with W/b already prepared by `prepare_params`.

    x:    [B, S]      activations (f32 or bf16)
    w_sl: [S, Lpad]   lane-padded, pre-transposed weight
    b2d:  [1, Lpad]   lane-padded bias

    If out_features is None (recommended hot-path usage), returns the
    lane-padded [B, Lpad] buffer whose columns >= L are exact zeros, avoiding
    an extra full HBM pass; downstream layers should consume/slice it fused.
    If out_features is given, returns [B, out_features].
    """
    B, S = x.shape
    S_w, Lpad = w_sl.shape
    assert S_w == S, "weight not prepared for this state dim"

    TB = _pick_batch_tile(B, block_b)
    nb = pl.cdiv(B, TB)

    out_dtype = x.dtype
    x_isz = jnp.dtype(x.dtype).itemsize
    w_isz = jnp.dtype(w_sl.dtype).itemsize
    o_isz = jnp.dtype(out_dtype).itemsize
    cost = pl.CostEstimate(
        flops=2 * B * S * Lpad,
        transcendentals=0,
        bytes_accessed=x_isz * B * S + w_isz * (S * Lpad + Lpad)
        + o_isz * B * Lpad,
    )

    out = pl.pallas_call(
        _linear_relu_kernel,
        out_shape=jax.ShapeDtypeStruct((B, Lpad), out_dtype),
        grid=(nb,),
        in_specs=[
            pl.BlockSpec((TB, S), lambda i: (i, 0)),     # x: tiled over batch
            pl.BlockSpec((S, Lpad), lambda i: (0, 0)),   # W: VMEM-resident
            pl.BlockSpec((1, Lpad), lambda i: (0, 0)),   # b: VMEM-resident
        ],
        out_specs=pl.BlockSpec((TB, Lpad), lambda i: (i, 0)),
        compiler_params=pltpu.CompilerParams(
            dimension_semantics=("parallel",),
        ),
        cost_estimate=cost,
    )(x, w_sl, b2d)

    if out_features is not None and out_features != Lpad:
        # Explicit slice for callers that need the exact PyTorch shape; the
        # padded columns are exact zeros so this only changes the shape.
        out = out[:, :out_features]
    return out


def init_params(key, state_dim, layer_size):
    """Deterministic Kaiming-normal init (nonlinearity='relu'), matching
    torch.nn.init.kaiming_normal_ on head_1.weight; bias ~ U(-1/sqrt(fan_in), .)
    like the PyTorch Linear default. Weight layout is PyTorch's [L, S]."""
    k_w, k_b = jax.random.split(key)
    std = math.sqrt(2.0 / state_dim)
    w = std * jax.random.normal(k_w, (layer_size, state_dim), dtype=jnp.float32)
    bound = 1.0 / math.sqrt(state_dim)
    b = jax.random.uniform(
        k_b, (layer_size,), minval=-bound, maxval=bound, dtype=jnp.float32
    )
    return w, b


def reference_forward(x, w, b):
    # Pure-JAX reference: relu(x @ W^T + b)
    return jnp.maximum(x.astype(jnp.float32) @ w.T + b, 0.0)


if __name__ == "__main__":
    # Small shapes consistent with the module: state_size=(32,), layer_size=64
    batch = 8
    state_dim = 32
    layer_size = 64

    key = jax.random.PRNGKey(0)
    k_x, k_p = jax.random.split(key)

    x = jax.random.normal(k_x, (batch, state_dim), dtype=jnp.float32)
    w_head, b_head = init_params(k_p, state_dim, layer_size)

    # ---- f32 path: exact check against the pure-JAX reference -------------
    w_sl, b2d, L = prepare_params(w_head, b_head)          # one-time prep
    fwd = jax.jit(lambda xx: forward(xx, w_sl, b2d, out_features=L))
    out = jax.block_until_ready(fwd(x))
    ref = reference_forward(x, w_head, b_head)
    assert out.shape == (batch, layer_size)
    assert jnp.allclose(out, ref, atol=1e-5, rtol=1e-5), "f32 mismatch"

    # Hot-path usage: padded output, no post-kernel slice (extra cols are 0).
    out_pad = jax.block_until_ready(forward(x, w_sl, b2d))
    assert out_pad.shape == (batch, _round_up(layer_size, _LANE))
    assert jnp.allclose(out_pad[:, :L], ref, atol=1e-5, rtol=1e-5)
    assert jnp.all(out_pad[:, L:] == 0.0), "padded columns must be exact zeros"

    # ---- bf16 storage path (half the HBM bytes; f32 accumulation) ---------
    w_sl_bf, b2d_bf, _ = prepare_params(w_head, b_head, dtype=jnp.bfloat16)
    out_bf = jax.block_until_ready(
        forward(x.astype(jnp.bfloat16), w_sl_bf, b2d_bf, out_features=L)
    )
    assert out_bf.dtype == jnp.bfloat16
    assert jnp.allclose(out_bf.astype(jnp.float32), ref, atol=5e-2, rtol=5e-2), \
        "bf16 mismatch"

    # ---- batch larger than one tile: multi-step grid + ragged final block -
    x_big = jax.random.normal(k_x, (300, state_dim), dtype=jnp.float32)
    out_big = jax.block_until_ready(forward(x_big, w_sl, b2d, out_features=L))
    ref_big = reference_forward(x_big, w_head, b_head)
    assert out_big.shape == (300, layer_size)
    assert jnp.allclose(out_big, ref_big, atol=1e-5, rtol=1e-5), "big-batch mismatch"

    print("KERNEL_OK")
</pallas_src>

<mosaic_0001>
module attributes {stable_mosaic.version = 11 : i64} {
  func.func @_linear_relu_kernel(%arg0: i32, %arg1: memref<8x32xf32, #tpu.memory_space<vmem>>, %arg2: memref<32x128xf32, #tpu.memory_space<vmem>>, %arg3: memref<1x128xf32, #tpu.memory_space<vmem>>, %arg4: memref<8x128xf32, #tpu.memory_space<vmem>>) attributes {dimension_semantics = [#tpu.dimension_semantics<parallel>], iteration_bounds = array<i64: 1>, scalar_prefetch = 0 : i64, scratch_operands = 0 : i64, tpu.core_type = #tpu.core_type<tc>, window_params = [{transform_indices = @transform_0, window_bounds = array<i64: 8, 32>}, {pipeline_mode = #tpu.pipeline_mode<synchronous>, transform_indices = @transform_1, window_bounds = array<i64: 32, 128>}, {pipeline_mode = #tpu.pipeline_mode<synchronous>, transform_indices = @transform_2, window_bounds = array<i64: 1, 128>}, {transform_indices = @transform_3, window_bounds = array<i64: 8, 128>}]} {
    %c0 = arith.constant 0 : index
    %c0_0 = arith.constant 0 : index
    %0 = vector.load %arg1[%c0, %c0_0] : memref<8x32xf32, #tpu.memory_space<vmem>>, vector<8x32xf32>
    %c0_1 = arith.constant 0 : index
    %c0_2 = arith.constant 0 : index
    %1 = vector.load %arg2[%c0_1, %c0_2] : memref<32x128xf32, #tpu.memory_space<vmem>>, vector<32x128xf32>
    %cst = arith.constant dense<0.000000e+00> : vector<8x128xf32>
    %2 = tpu.matmul %0, %1, %cst {dimension_numbers = #tpu.dot_dimension_numbers<[1], [0], [0], [1], [0, 0, 1, 1], [], []>} : vector<8x32xf32>, vector<32x128xf32>, vector<8x128xf32> -> vector<8x128xf32>
    %c0_3 = arith.constant 0 : index
    %c0_4 = arith.constant 0 : index
    %3 = vector.load %arg3[%c0_3, %c0_4] : memref<1x128xf32, #tpu.memory_space<vmem>>, vector<1x128xf32>
    %4 = vector.broadcast %3 : vector<1x128xf32> to vector<8x128xf32>
    %5 = arith.addf %2, %4 : vector<8x128xf32>
    %cst_5 = arith.constant 0.000000e+00 : f32
    %6 = vector.broadcast %cst_5 : f32 to vector<8x128xf32>
    %7 = arith.maximumf %5, %6 : vector<8x128xf32>
    %c0_6 = arith.constant 0 : index
    %c0_7 = arith.constant 0 : index
    %8 = vector.load %arg4[%c0_6, %c0_7] : memref<8x128xf32, #tpu.memory_space<vmem>>, vector<8x128xf32>
    tpu.vector_store %arg4[%c0_6, %c0_7], %7 {strides = array<i32>} : memref<8x128xf32, #tpu.memory_space<vmem>>, vector<8x128xf32>,
    return
  }
  func.func @transform_0(%arg0: i32) -> (i32, i32) {
    %c0_i32 = arith.constant 0 : i32
    %c0_i32_0 = arith.constant 0 : i32
    return %arg0, %c0_i32 : i32, i32
  }
  func.func @transform_1(%arg0: i32) -> (i32, i32) {
    %c0_i32 = arith.constant 0 : i32
    %c0_i32_0 = arith.constant 0 : i32
    %c0_i32_1 = arith.constant 0 : i32
    return %c0_i32, %c0_i32_0 : i32, i32
  }
  func.func @transform_2(%arg0: i32) -> (i32, i32) {
    %c0_i32 = arith.constant 0 : i32
    %c0_i32_0 = arith.constant 0 : i32
    %c0_i32_1 = arith.constant 0 : i32
    return %c0_i32, %c0_i32_0 : i32, i32
  }
  func.func @transform_3(%arg0: i32) -> (i32, i32) {
    %c0_i32 = arith.constant 0 : i32
    %c0_i32_0 = arith.constant 0 : i32
    return %arg0, %c0_i32 : i32, i32
  }
}

</mosaic_0001>

<bundles_post_ra>
// kernel: _lambda_.1
= control target key start
LH: loop header
LB: loop body
LE: loop exit
PB: predicated region body
PF: predicated region fallthrough
CT: control target
= control target key end

     0   :  { %8 = vsyncpa [#allocation3], 0  ;;  %s220_s0 = inlined_call_operand.hbm [shape: f32[8,32], index: 0, kind: input, shape index: {}]   ;;  %s221_s1 = inlined_call_operand.hbm [shape: f32[32,128], index: 1, kind: input, shape index: {}]   ;;  %s222_s2 = inlined_call_operand.vmem [shape: f32[1,128], index: 2, kind: input, shape index: {}]   ;;  %s223_s3 = inlined_call_operand.hbm [shape: f32[8,128], index: 3, kind: output, shape index: {}]  }
   0x1   :  { %9 = vsyncpa [#allocation6], 0 }
   0x2   :  { %10 = vsyncpa [#allocation4], 0  ;;  %s16_s14 = sshll.u32 %s220_s0, 4  ;;  %s183_s15 = smov [#allocation2]   ;;  %s17_s14 = int_to_ptr.hbm [resolvable:$true] %s16_s14 }
   0x3   :  { %s18_s16 = sshll.u32 %s183_s15, 4  ;;  %s26_s19 = sshll.u32 %s221_s1, 4  ;;  %s19_s16 = int_to_ptr.vmem [resolvable:$true] %s18_s16  ;;  %s27_s19 = int_to_ptr.hbm [resolvable:$true] %s26_s19 }
   0x4   :  { %21 = dma.hbm_to_vmem [thread:$0]  %s17_s14, 128, %s19_s16, [#allocation3]  }
   0x5   :  { %s184_s20 = smov [#allocation5]   ;;  %s185_s22 = smov 128  }
   0x6   :  { %s28_s21 = sshll.u32 %s184_s20, 4  ;;  %s186_s23 = smov 8   ;;  %s29_s21 = int_to_ptr.vmem [resolvable:$true] %s28_s21 }
   0x7   :  { %34 = dma.hbm_to_vmem [thread:$0]  %s27_s19, 512, %s29_s21, [#allocation6], %s185_s22, %s185_s22, %s186_s23  }
   0x8   :  { %177 = dma.done.wait [#allocation3], 128  }
   0x9   :  { %178 = vsyncadd [#allocation3], 4294967168 }
   0xa   :  { %179 = dma.done.wait [#allocation6], 512  }
   0xb   :  { %180 = vsyncadd [#allocation6], 4294966784  ;;  %v49_v0 = vld [vmem:[#allocation5 + $0x18] sm:$0xff]  ;;  %v48_v1 = vld [vmem:[#allocation5 + $0x10] sm:$0xff]  ;;  %vm54_vm0 = vcmask 261120   ;;  %s187_s24 = smov [#allocation7]  }
   0xc   :  { %70 = vmatpush.msra.mxu0 %v49_v0  ;;  %v47_v2 = vld [vmem:[#allocation5 + $0x8] sm:$0xff]  ;;  %v46_v3 = vld [vmem:[#allocation5] sm:$0xff]  ;;  %v45_v4 = vld [vmem:[#allocation2] sm:$0xff]  ;;  %s85_s25 = sshll.u32 %s187_s24, 4  ;;  %s87_s28 = sshll.u32 %s223_s3, 4  ;;  %s86_s25 = int_to_ptr.vmem [resolvable:$true] %s85_s25  ;;  %s88_s28 = int_to_ptr.hbm [resolvable:$true] %s87_s28 }
   0xd   :  { %v104_v5 = vld [vmem:[%s222_s2] ss:$0 sm:$0xff] }
   0xe   :  { %71 = vmatpush.msra.mxu0 %v48_v1 }
  0x10   :  { %72 = vmatpush.msra.mxu0 %v47_v2 }
  0x12   :  { %73 = vmatpush.msra.mxu0 %v46_v3 }
  0x13   :  { %98 = vmatmul.msk.f32.vlgmr.msra.gmra.mxu0 %vm54_vm0, %v45_v4 }
  0x90   :  { %v75_v6 = vpop.f32.mrf.mxu0 }
  0x91   :  { %v76_v7 = vadd.f32 %v104_v5, %v75_v6 }
  0x93   :  { %v78_v8 = vmax.f32 %v76_v7, 0.0 }
  0x95   :  { %79 = vst [vmem:[#allocation7] sm:$0xff] %v78_v8 }
  0x96   :  { %90 = dma.vmem_to_hbm [thread:$0]  %s86_s25, 128, %s88_s28, [#allocation4]  }
  0x97   :  { %181 = dma.done.wait [#allocation4], 128  }
  0x98   :  { %182 = vsyncadd [#allocation4], 4294967168 }
  0x99   :  { %95 = vsyncpa [#allocation3], 1 }
  0x9a   :  { %96 = vsyncpa [#allocation6], 1 }
  0x9b   :  { %97 = vsyncpa [#allocation4], 1 }

</bundles_post_ra>
